<compile_context>
chip_gen: v7x
topology: tpu7x:2x2x1
jax: 0.10.0
libtpu: 0.0.40
codegen_flags: <defaults>
</compile_context>

<pallas_src>
import jax
import jax.numpy as jnp
from jax.experimental import pallas as pl
from jax.experimental.pallas import tpu as pltpu


def _fc_bn_relu_kernel(x_ref, w_ref, scale_ref, shift_ref, out_ref):
    # x_ref:     (1, C_in,  TN)  current (batch, spatial) tile
    # w_ref:     (C_out, C_in)   conv weight (kernel_size=1, squeezed)
    # scale_ref: (C_out, 1)      folded BN scale
    # shift_ref: (C_out, 1)      folded BN shift
    # out_ref:   (1, C_out, TN)
    x = x_ref[0]                                   # (C_in, TN)
    w = w_ref[...]                                 # (C_out, C_in)
    # 1x1 conv == matmul over channels; accumulate in f32 on the MXU.
    y = jnp.dot(w, x, preferred_element_type=jnp.float32)   # (C_out, TN)
    # Fused BatchNorm (per-output-channel affine) + ReLU on the VPU.
    y = y * scale_ref[...] + shift_ref[...]
    out_ref[0] = jnp.maximum(y, 0.0).astype(out_ref.dtype)


def _pick_tile(n):
    """Largest lane-dense tile (multiple of 128) that divides N, else N."""
    for tn in (1024, 512, 256, 128):
        if n % tn == 0:
            return tn
    return n  # small / ragged N: single full-extent tile along spatial axis


def fc_bn_relu_1d(x, weight, gamma, beta, running_mean, running_var, eps=1e-5):
    """Fused Conv1d(k=1, bias=False) + BatchNorm1d(eval) + ReLU.

    x:       (B, C_in, N) float
    weight:  (C_out, C_in, 1) or (C_out, C_in)
    gamma, beta, running_mean, running_var: (C_out,)
    returns: (B, C_out, N) float32
    """
    x = x.astype(jnp.float32)
    if weight.ndim == 3:
        weight = weight[..., 0]
    weight = weight.astype(jnp.float32)

    b, c_in, n = x.shape
    c_out = weight.shape[0]

    # Fold BN (running stats) into per-channel scale / shift at trace time.
    inv_std = gamma.astype(jnp.float32) * jax.lax.rsqrt(
        running_var.astype(jnp.float32) + jnp.float32(eps))
    scale = inv_std.reshape(c_out, 1)
    shift = (beta.astype(jnp.float32)
             - running_mean.astype(jnp.float32) * inv_std).reshape(c_out, 1)

    tn = _pick_tile(n)
    grid = (b, n // tn)

    out = pl.pallas_call(
        _fc_bn_relu_kernel,
        out_shape=jax.ShapeDtypeStruct((b, c_out, n), jnp.float32),
        grid_spec=pltpu.PrefetchScalarGridSpec(
            num_scalar_prefetch=0,
            grid=grid,
            in_specs=[
                pl.BlockSpec((1, c_in, tn), lambda bi, ni: (bi, 0, ni)),
                pl.BlockSpec((c_out, c_in), lambda bi, ni: (0, 0)),
                pl.BlockSpec((c_out, 1), lambda bi, ni: (0, 0)),
                pl.BlockSpec((c_out, 1), lambda bi, ni: (0, 0)),
            ],
            out_specs=pl.BlockSpec((1, c_out, tn), lambda bi, ni: (bi, 0, ni)),
        ),
        compiler_params=pltpu.CompilerParams(
            # Both grid axes are independent -> megacore sharding on v7x,
            # double-buffered DMA pipelining on all gens.
            dimension_semantics=("parallel", "parallel"),
        ),
    )(x, weight, scale, shift)
    return out


if __name__ == "__main__":
    key = jax.random.PRNGKey(0)
    kx, kw, kg, kb, km, kv = jax.random.split(key, 6)

    # Small shapes consistent with the module: batch=2, in_channels=4,
    # out_channels=32, spatial N=128 (lane-dense tile).
    B, C_IN, C_OUT, N = 2, 4, 32, 128

    x = jax.random.normal(kx, (B, C_IN, N), dtype=jnp.float32)
    weight = jax.random.normal(kw, (C_OUT, C_IN, 1), dtype=jnp.float32) * 0.1
    gamma = 1.0 + 0.1 * jax.random.normal(kg, (C_OUT,), dtype=jnp.float32)
    beta = 0.1 * jax.random.normal(kb, (C_OUT,), dtype=jnp.float32)
    running_mean = 0.05 * jax.random.normal(km, (C_OUT,), dtype=jnp.float32)
    running_var = 0.9 + 0.1 * jnp.abs(
        jax.random.normal(kv, (C_OUT,), dtype=jnp.float32))
    eps = 1e-5

    out = fc_bn_relu_1d(x, weight, gamma, beta, running_mean, running_var, eps)
    out = jax.block_until_ready(out)

    # Plain-JAX reference (matches torch eval-mode forward of FCBNReLU1D).
    y_ref = jnp.einsum("oc,bcn->bon", weight[..., 0], x)
    inv = gamma / jnp.sqrt(running_var + eps)
    y_ref = y_ref * inv[None, :, None] + (beta - running_mean * inv)[None, :, None]
    ref = jnp.maximum(y_ref, 0.0)

    assert out.shape == (B, C_OUT, N), out.shape
    assert jnp.allclose(out, ref, atol=1e-5, rtol=1e-5), (
        float(jnp.max(jnp.abs(out - ref))))

    print("KERNEL_OK")
</pallas_src>

<mosaic_0001>
module attributes {stable_mosaic.version = 11 : i64} {
  func.func @_fc_bn_relu_kernel(%arg0: i32, %arg1: i32, %arg2: memref<1x4x128xf32, #tpu.memory_space<vmem>>, %arg3: memref<32x4xf32, #tpu.memory_space<vmem>>, %arg4: memref<32x1xf32, #tpu.memory_space<vmem>>, %arg5: memref<32x1xf32, #tpu.memory_space<vmem>>, %arg6: memref<1x32x128xf32, #tpu.memory_space<vmem>>) attributes {dimension_semantics = [#tpu.dimension_semantics<parallel>, #tpu.dimension_semantics<parallel>], iteration_bounds = array<i64: 2, 1>, scalar_prefetch = 0 : i64, scratch_operands = 0 : i64, tpu.core_type = #tpu.core_type<tc>, window_params = [{transform_indices = @transform_0, window_bounds = array<i64: 1, 4, 128>}, {pipeline_mode = #tpu.pipeline_mode<synchronous>, transform_indices = @transform_1, window_bounds = array<i64: 32, 4>}, {pipeline_mode = #tpu.pipeline_mode<synchronous>, transform_indices = @transform_2, window_bounds = array<i64: 32, 1>}, {pipeline_mode = #tpu.pipeline_mode<synchronous>, transform_indices = @transform_3, window_bounds = array<i64: 32, 1>}, {transform_indices = @transform_4, window_bounds = array<i64: 1, 32, 128>}]} {
    %c0 = arith.constant 0 : index
    %c0_0 = arith.constant 0 : index
    %c0_1 = arith.constant 0 : index
    %0 = vector.load %arg2[%c0, %c0_0, %c0_1] : memref<1x4x128xf32, #tpu.memory_space<vmem>>, vector<1x4x128xf32>
    %1 = vector.shape_cast %0 : vector<1x4x128xf32> to vector<4x128xf32>
    %c0_2 = arith.constant 0 : index
    %c0_3 = arith.constant 0 : index
    %2 = vector.load %arg3[%c0_2, %c0_3] : memref<32x4xf32, #tpu.memory_space<vmem>>, vector<32x4xf32>
    %cst = arith.constant dense<0.000000e+00> : vector<32x128xf32>
    %3 = tpu.matmul %2, %1, %cst {dimension_numbers = #tpu.dot_dimension_numbers<[1], [0], [0], [1], [0, 0, 1, 1], [], []>} : vector<32x4xf32>, vector<4x128xf32>, vector<32x128xf32> -> vector<32x128xf32>
    %c0_4 = arith.constant 0 : index
    %c0_5 = arith.constant 0 : index
    %4 = vector.load %arg4[%c0_4, %c0_5] : memref<32x1xf32, #tpu.memory_space<vmem>>, vector<32x1xf32>
    %5 = vector.broadcast %4 : vector<32x1xf32> to vector<32x128xf32>
    %6 = arith.mulf %3, %5 : vector<32x128xf32>
    %c0_6 = arith.constant 0 : index
    %c0_7 = arith.constant 0 : index
    %7 = vector.load %arg5[%c0_6, %c0_7] : memref<32x1xf32, #tpu.memory_space<vmem>>, vector<32x1xf32>
    %8 = vector.broadcast %7 : vector<32x1xf32> to vector<32x128xf32>
    %9 = arith.addf %6, %8 : vector<32x128xf32>
    %cst_8 = arith.constant 0.000000e+00 : f32
    %10 = vector.broadcast %cst_8 : f32 to vector<32x128xf32>
    %11 = arith.maximumf %9, %10 : vector<32x128xf32>
    %c0_9 = arith.constant 0 : index
    %c0_10 = arith.constant 0 : index
    %c0_11 = arith.constant 0 : index
    %12 = vector.load %arg6[%c0_9, %c0_10, %c0_11] : memref<1x32x128xf32, #tpu.memory_space<vmem>>, vector<1x32x128xf32>
    %13 = vector.shape_cast %12 : vector<1x32x128xf32> to vector<32x128xf32>
    %14 = vector.shape_cast %11 : vector<32x128xf32> to vector<1x32x128xf32>
    tpu.vector_store %arg6[%c0_9, %c0_10, %c0_11], %14 {strides = array<i32>} : memref<1x32x128xf32, #tpu.memory_space<vmem>>, vector<1x32x128xf32>,
    return
  }
  func.func @transform_0(%arg0: i32, %arg1: i32) -> (i32, i32, i32) {
    %c0_i32 = arith.constant 0 : i32
    %c0_i32_0 = arith.constant 0 : i32
    return %arg0, %c0_i32, %arg1 : i32, i32, i32
  }
  func.func @transform_1(%arg0: i32, %arg1: i32) -> (i32, i32) {
    %c0_i32 = arith.constant 0 : i32
    %c0_i32_0 = arith.constant 0 : i32
    %c0_i32_1 = arith.constant 0 : i32
    return %c0_i32, %c0_i32_0 : i32, i32
  }
  func.func @transform_2(%arg0: i32, %arg1: i32) -> (i32, i32) {
    %c0_i32 = arith.constant 0 : i32
    %c0_i32_0 = arith.constant 0 : i32
    %c0_i32_1 = arith.constant 0 : i32
    return %c0_i32, %c0_i32_0 : i32, i32
  }
  func.func @transform_3(%arg0: i32, %arg1: i32) -> (i32, i32) {
    %c0_i32 = arith.constant 0 : i32
    %c0_i32_0 = arith.constant 0 : i32
    %c0_i32_1 = arith.constant 0 : i32
    return %c0_i32, %c0_i32_0 : i32, i32
  }
  func.func @transform_4(%arg0: i32, %arg1: i32) -> (i32, i32, i32) {
    %c0_i32 = arith.constant 0 : i32
    %c0_i32_0 = arith.constant 0 : i32
    return %arg0, %c0_i32, %arg1 : i32, i32, i32
  }
}

</mosaic_0001>

<bundles_post_ra>
// kernel: tpu_custom_call.1
= control target key start
LH: loop header
LB: loop body
LE: loop exit
PB: predicated region body
PF: predicated region fallthrough
CT: control target
= control target key end

     0   :  { %9 = vsyncpa [#allocation3], 0  ;;  %s840_s0 = inlined_call_operand.vmem [shape: f32[2,4,128], index: 0, kind: input, shape index: {}]   ;;  %s841_s1 = inlined_call_operand.vmem [shape: f32[32,4], index: 1, kind: input, shape index: {}]   ;;  %s842_s2 = inlined_call_operand.vmem [shape: f32[32,1], index: 2, kind: input, shape index: {}]   ;;  %s843_s3 = inlined_call_operand.vmem [shape: f32[32,1], index: 3, kind: input, shape index: {}]   ;;  %s844_s4 = inlined_call_operand.hbm [shape: f32[2,32,128], index: 4, kind: output, shape index: {}]  }
   0x1   :  { %11 = vsyncpa [#allocation3 + $0x1], 0  ;;  %s681_s15 = smov 0   ;;  %s683_s16 = smov 0  }
   0x2   :  { %s685_s17 = smov 0   ;;  %s687_s18 = smov 0  }
   0x3   :  { %s689_s19 = smov 0   ;;  %s691_s20 = smov 0  }
   0x4 LB: > { %s479_s21 = sadd.s32 4294967295, %s650_s20   ;;  %s480_s22 = sadd.s32 4294967294, %s650_s20   ;;  %s650_s20 = sphi %s691_s20, %s17_s20   ;;  %s646_s19 = sphi %s689_s19, %s851_s19   ;;  %s642_s18 = sphi %s687_s18, %s850_s18   ;;  %s638_s17 = sphi %s685_s17, %s849_s17   ;;  %s634_s16 = sphi %s683_s16, %s848_s16   ;;  %s630_s15 = sphi %s681_s15, %s847_s15  }
   0x5   : > { %s29_s23 = sadd.s32 1, %s646_s19  ;;  %s129_s24 = sadd.s32 1, %s638_s17 }
   0x6   : > { %p31_p0 = scmp.ge.s32.totalorder %s29_s23, 2  ;;  %p139_p1 = scmp.ne.s32.totalorder %s638_s17, %s634_s16 }
   0x7   : > { %p140_p2 = scmp.eq.s32.totalorder %s479_s21, 1  ;;  %p145_p3 = scmp.ne.s32.totalorder %s634_s16, %s630_s15 }
   0x8   : > { %s853_s23 = smov (%p31_p0, %s29_s23), 0  ;;  %p146_p5 = scmp.eq.s32.totalorder %s480_s22, 1 }
   0x9   : > { %p721_p4 = por %p140_p2, %p139_p1  ;;  %s124_s26 = ssub.s32 %s646_s19, %s853_s23 }
   0xa   : > { %p483_p6 = scmp.ge.s32.totalorder %s650_s20, 1  ;;  %p127_p7 = scmp.eq.s32.totalorder %s124_s26, 0 }
   0xb   : > { %p728_p8 = por %p146_p5, %p145_p3  ;;  %p183_p9 = scmp.lt.s32.totalorder %s650_s20, 3 }
   0xc   : > { %s734_s28 = scalar_select %p127_p7, %s638_s17, %s129_s24  }
   0xd   : > { %p184_p10 = pnand %p483_p6, %p183_p9 }
   0xe   : > { %p211_p11 = scmp.lt.s32.totalorder (!%p184_p10), %s642_s18, 1  ;;  %v219_v0 = vld [vmem:[%s841_s1] sm:$0xff] (!%p184_p10)  ;;  %vm223_vm0 = vcmask (!%p184_p10), 31744   ;;  %v221_v1 = vld [vmem:[%s841_s1 + $0x10] sm:$0xff] (!%p184_p10)  ;;  %v652_v4 = vmov (!%p184_p10), 0   ;;  %vm236_vm1 = vcmask (!%p184_p10), 1043456  }
   0xf   : > { %187 = sbr.rel (%p184_p10) target bundleno = 263 (0x107), region = 36  ;;  %504 = vmatprep.mubr.msk.f32.mxu0 (!%p184_p10), %vm223_vm0, %v219_v0  ;;  %507 = vmatprep.mubr.msk.f32.mxu1 (!%p184_p10), %vm223_vm0, %v221_v1  ;;  %v327_v2 = vld [vmem:[%s842_s2 + $0x10] sm:$0xff] (!%p184_p10)  ;;  %v325_v3 = vld [vmem:[%s842_s2] sm:$0xff] (!%p184_p10)  ;;  %v220_v6 = vld [vmem:[%s841_s1 + $0x8] sm:$0xff] (!%p184_p10)  ;;  %s208_s22 = sand.u32 (!%p184_p10), 1, %s634_s16  }
  0x10   : > { %571 = vset.pattern.permute.xlu1 (!%p184_p10), %v652_v4  ;;  %570 = vset.pattern.permute.xlu0 (!%p184_p10), %v652_v4  ;;  %v222_v7 = vld [vmem:[%s841_s1 + $0x18] sm:$0xff] (!%p184_p10)  ;;  %v326_v9 = vld [vmem:[%s842_s2 + $0x8] sm:$0xff] (!%p184_p10)  ;;  %v353_v11 = vld [vmem:[%s843_s3] sm:$0xff] (!%p184_p10)  ;;  %s484_s24 = sshll.u32 (!%p184_p10), %s208_s22, 5  ;;  %s496_s30 = sshll.u32 (!%p184_p10), %s642_s18, 9 }
  0x11   : > { %341 = vperm.xlu1 (!%p184_p10), %571, %v327_v2   ;;  %331 = vperm.xlu0 (!%p184_p10), %570, %v325_v3   ;;  %v328_v8 = vld [vmem:[%s842_s2 + $0x18] sm:$0xff] (!%p184_p10)  ;;  %v354_v10 = vld [vmem:[%s843_s3 + $0x8] sm:$0xff] (!%p184_p10)  ;;  %v355_v13 = vld [vmem:[%s843_s3 + $0x10] sm:$0xff] (!%p184_p10)  ;;  %s210_s26 = scalar_lea.vmem (!%p184_p10), [#allocation2], %s484_s24  ;;  %s790_s7 = scalar_lea.hbm (!%p184_p10), %s844_s4, %s496_s30 }
  0x12   : > { %v356_v12 = vld [vmem:[%s843_s3 + $0x18] sm:$0xff] (!%p184_p10)  ;;  %s404_s29 = sshll.u32 (!%p184_p10), %s210_s26, 4  ;;  %s653_s9 = smov (!%p184_p10), [#allocation2]   ;;  %s785_s29 = int_to_ptr.vmem [resolvable:$true] %s404_s29 }
  0x13   : > { %s572_s8 = scalar_lea.vmem (!%p184_p10), %s785_s29, 512  ;;  %s576_s10 = sshll.u32 (!%p184_p10), %s653_s9, 4  ;;  %s577_s10 = int_to_ptr.vmem [resolvable:$false] %s576_s10 }
  0x14   : > { %p573_p12 = scmp.ne.s32.totalorder (!%p184_p10), %s785_s29, %s572_s8  ;;  %p579_p1 = scmp.lt.s32.totalorder (!%p184_p10), %s785_s29, %s577_s10 }
  0x15   : > { %346 = vperm.xlu1 (!%p184_p10), %571, %v328_v8   ;;  %336 = vperm.xlu0 (!%p184_p10), %570, %v326_v9  }
  0x16   : > { %s212_s11 = scalar_select %p211_p11, %s642_s18, 1 }
  0x17   : > { %s794_s18 = scalar_lea.sflag [#allocation3], %s208_s22  ;;  %p574_p13 = pnand %p573_p12, %p721_p4 }
  0x18   : > { %s485_s12 = sshll.u32 %s212_s11, 2  ;;  %s578_s11 = scalar_lea.vmem %s577_s10, 1024 }
  0x19   : > { %s217_s21 = scalar_lea.vmem %s840_s0, %s485_s12  ;;  %364 = vperm.xlu1 %571, %v354_v10   ;;  %359 = vperm.xlu0 %570, %v353_v11   ;;  %p575_p0 = pneg %p574_p13 }
  0x1a   : > { %v218_v5 = vld [vmem:[%s217_s21] sm:$0xf]  ;;  %p580_p2 = scmp.lt.s32.totalorder %s578_s11, %s572_s8 }
  0x1b   : > { %502 = vmatprep.subr.msk.mxu0 %vm236_vm1, %v218_v5  ;;  %510 = vmatprep.subr.msk.mxu1 %vm236_vm1, %v218_v5 }
  0x1c   : > { %503 = vmatpush3.msk.msra.mxu0 %vm236_vm1, %v218_v5  ;;  %511 = vmatpush3.msk.msra.mxu1 %vm236_vm1, %v218_v5  ;;  %p581_p3 = por %p580_p2, %p579_p1 }
  0x1d   : > { %505 = vmatmul.mubr.msk.f32.vlgmr.msra.gmra.mrb[0].mxu0 %vm223_vm0, %v220_v6  ;;  %508 = vmatmul.mubr.msk.f32.vlgmr.msra.gmra.mrb[0].mxu1 %vm223_vm0, %v222_v7 }
  0x1e   : > { %374 = vperm.xlu1 %571, %v356_v12   ;;  %369 = vperm.xlu0 %570, %v355_v13   ;;  %p582_p5 = pnand %p581_p3, %p575_p0 }
  0x90   : > { %v342_v14 = vpop.permute.xlu1 %341  ;;  %v332_v15 = vpop.permute.xlu0 %331 }
  0x94   : > { %v347_v16 = vpop.permute.xlu1 %346  ;;  %v337_v17 = vpop.permute.xlu0 %336 }
  0x98   : > { %v365_v18 = vpop.permute.xlu1 %364  ;;  %v360_v19 = vpop.permute.xlu0 %359 }
  0x9d   : > { %v375_v26 = vpop.permute.xlu1 %374  ;;  %v370_v29 = vpop.permute.xlu0 %369 }
  0xf0   : > { %v506_v20 = vpop.f32.mrb[0].mxu0  ;;  %v509_v21 = vpop.f32.mrb[0].mxu1 }
  0xf1   : > { %v350_v22 = vmul.f32 %v506_v20, %v337_v17  ;;  %v352_v23 = vmul.f32 %v509_v21, %v347_v16  ;;  %v306_v24 = vpop.f32.mrb[1].mxu0  ;;  %v316_v25 = vpop.f32.mrb[1].mxu1 }
  0xf2   : > { %v349_v27 = vmul.f32 %v332_v15, %v306_v24  ;;  %v351_v28 = vmul.f32 %v342_v14, %v316_v25 }
  0xf3   : > { %v378_v30 = vadd.f32 %v365_v18, %v350_v22  ;;  %v380_v31 = vadd.f32 %v375_v26, %v352_v23 }
  0xf4   : > { %v377_v32 = vadd.f32 %v360_v19, %v349_v27  ;;  %v379_v33 = vadd.f32 %v370_v29, %v351_v28 }
  0xf5   : > { %v382_v34 = vmax.f32 %v378_v30, 0.0  ;;  %v384_v35 = vmax.f32 %v380_v31, 0.0 }
  0xf6   : > { %v381_v36 = vmax.f32 %v377_v32, 0.0  ;;  %v383_v37 = vmax.f32 %v379_v33, 0.0 }
  0xf7   : > { %386 = vst [vmem:[%s210_s26 + $0x8] sm:$0xff] %v382_v34  ;;  %388 = vst [vmem:[%s210_s26 + $0x18] sm:$0xff] %v384_v35 }
  0xf8   : > { %385 = vst [vmem:[%s210_s26] sm:$0xff] %v381_v36  ;;  %387 = vst [vmem:[%s210_s26 + $0x10] sm:$0xff] %v383_v37 }
  0xf9   : > { %585 = shalt.err (!%p582_p5)
}
  0xfa   : > { %s586_s12 = scalar_lea.hbm %s790_s7, 512  ;;  %s590_s21 = scalar_lea.hbm %s844_s4, 1024 }
  0xfb   : > { %p587_p6 = scmp.ne.s32.totalorder %s790_s7, %s586_s12  ;;  %p591_p10 = scmp.lt.u32.totalorder %s790_s7, %s844_s4 }
  0xfc   : > { %p592_p11 = scmp.lt.u32.totalorder %s590_s21, %s586_s12  ;;  %p594_p13 = scmp.lt.u32.totalorder %s586_s12, %s790_s7 }
  0xfd   : > { %p588_p7 = pnand %p587_p6, %p721_p4 }
  0xfe   : > { %p593_p12 = por %p592_p11, %p591_p10 }
  0xff   : > { %p589_p9 = pneg %p588_p7 }
 0x100   : > { %p595_p0 = por %p594_p13, %p593_p12 }
 0x102   : > { %p596_p1 = pnand %p595_p0, %p589_p9 }
 0x104   : > { %599 = shalt.err (!%p596_p1)
}
 0x105   : > { %s654_s26 = smov 128   ;;  %s655_s30 = smov 8  }
 0x106   : > { %512 = dma.vmem_to_hbm [thread:$0]  (%p721_p4), %s785_s29, 512, %s790_s7, %s794_s18, %s654_s26, %s654_s26, %s655_s30  }
 0x107 PF: > { %p518_p2 = scmp.ge.s32.totalorder %s650_s20, 2  ;;  %s419_s5 = sand.u32 1, %s630_s15  }
 0x108   : > { %s420_s6 = scalar_lea.sflag [#allocation3], %s419_s5 }
 0x109   : > { %p515_p3 = pnand %p518_p2, %p728_p8 }
 0x10b   : > { %625 = dma.done.wait (!%p515_p3), %s420_s6, 512  }
 0x10c   : > { %627 = vsyncadd (!%p515_p3), %s420_s6, 4294966784  ;;  %s17_s20 = sadd.s32 1, %s650_s20   ;;  %s847_s15 = smov %s634_s16 }
 0x10d   : > { %p14_p5 = scmp.ge.s32.totalorder %s17_s20, 4   ;;  %s848_s16 = smov %s638_s17 }
 0x10e   : > { %s849_s17 = smov %s734_s28  ;;  %s850_s18 = smov %s646_s19 }
 0x10f   : > { %s851_s19 = smov %s853_s23  ;;  %16 = sbr.rel (!%p14_p5) target bundleno = 4 (0x4), region = 71 }
 0x116   :  { %425 = vsyncpa [#allocation3], 1 }
 0x117   :  { %427 = vsyncpa [#allocation3 + $0x1], 1 }

</bundles_post_ra>
